<compile_context>
chip_gen: v7x
topology: tpu7x:2x2x1
jax: 0.10.0
libtpu: 0.0.40
codegen_flags: <defaults>
</compile_context>

<pallas_src>
import jax
import jax.numpy as jnp
from jax.experimental import pallas as pl
from jax.experimental.pallas import tpu as pltpu


# ----------------------------------------------------------------------------- helpers
def _round_up(x, m):
    return ((x + m - 1) // m) * m


def _round_down(x, m):
    return (x // m) * m


def _vmem_limit_bytes():
    """Generation-aware scoped-VMEM limit, leaving ~25% headroom for DMA/compiler."""
    try:
        cap = pltpu.get_tpu_info().vmem_capacity_bytes
    except Exception:
        cap = 64 * 1024 * 1024          # v7x per-TC capacity (smallest current gen)
    return int(cap * 3 // 4)            # ~48 MiB on v7x, ~96 MiB on v5e/v6e


def _estimate_vmem_bytes(tile_b, D, L, in_itemsize, probs_itemsize, compute_probs):
    """Per-grid-step VMEM footprint, including in-kernel temporaries."""
    lp = max(128, _round_up(L, 128))                      # lane-padded label dim
    total = 0
    total += 2 * 2 * tile_b * D * in_itemsize             # rep_a / rep_b, double-buffered
    total += 2 * tile_b * 128 * 4                         # labels (tile_b,1) lane-padded, x2 bufs
    total += 2 * 3 * D * lp * in_itemsize                 # resident weight slabs (x2 safety)
    total += 8 * 128 * 4                                  # bias
    total += 2 * 8 * 128 * 4                              # per-tile loss partial output
    if compute_probs:
        total += 2 * tile_b * lp * probs_itemsize         # probs output, double-buffered
    total += tile_b * D * in_itemsize                     # |a - b| temporary (native dtype)
    total += 4 * tile_b * lp * 4                          # logits / exp / iota / one-hot (f32)
    return total


# ----------------------------------------------------------------------------- kernel
def _make_kernel(batch_size, tile_b, compute_probs):
    def kernel(rep_a_ref, rep_b_ref, wa_ref, wb_ref, wd_ref, bias_ref,
               labels_ref, *out_refs):
        if compute_probs:
            probs_ref, nll_ref = out_refs
        else:
            (nll_ref,) = out_refs

        # Native-dtype operands: bf16 goes straight to the MXU (no f32 temporaries),
        # f32 inputs keep full f32 math.
        a = rep_a_ref[...]                               # (tile_b, D)
        b = rep_b_ref[...]                               # (tile_b, D)
        diff = jnp.abs(a - b)                            # (tile_b, D), native dtype

        # logits = [a | b | |a-b|] @ W.T + bias, as three MXU matmuls with f32 acc.
        logits = (
            jnp.dot(a, wa_ref[...], preferred_element_type=jnp.float32)
            + jnp.dot(b, wb_ref[...], preferred_element_type=jnp.float32)
            + jnp.dot(diff, wd_ref[...], preferred_element_type=jnp.float32)
            + bias_ref[...]
        )                                                # (tile_b, L) f32

        # Row-wise numerically-stable softmax; exact reciprocal (tolerance-safe).
        m = jnp.max(logits, axis=-1, keepdims=True)      # (tile_b, 1)
        e = jnp.exp(logits - m)                          # (tile_b, L)
        s = jnp.sum(e, axis=-1, keepdims=True)           # (tile_b, 1)
        inv_s = pl.reciprocal(s)

        if compute_probs:
            probs_ref[...] = (e * inv_s).astype(probs_ref.dtype)

        # Per-row NLL: -log_softmax[label] = m + log(s) - logit[label].
        lbl = labels_ref[...]                                              # (tile_b, 1) i32
        class_ids = jax.lax.broadcasted_iota(jnp.int32, logits.shape, 1)   # (tile_b, L)
        one_hot = (class_ids == lbl).astype(jnp.float32)
        picked = jnp.sum(logits * one_hot, axis=-1, keepdims=True)         # (tile_b, 1)
        nll = (m + jnp.log(s)) - picked                                    # (tile_b, 1)

        # Mask ragged rows of the last tile IN-KERNEL: padded rows may be garbage
        # (even NaN); jnp.where selects 0.0 for them so the partial sum stays clean.
        row = jax.lax.broadcasted_iota(jnp.int32, (tile_b, 1), 0)
        valid = (pl.program_id(0) * tile_b + row) < batch_size
        nll = jnp.where(valid, nll, 0.0)

        # Lane-dense per-tile partial sum: one full (8,128) slab, unmasked store.
        partial = jnp.sum(nll, keepdims=True)                              # (1, 1) f32
        nll_ref[0] = jnp.broadcast_to(partial, (8, 128))

    return kernel


# ----------------------------------------------------------------------------- wrapper
def prepare_classifier_params(W, b, dtype=jnp.float32):
    """One-time prep: split nn.Linear weight (L, 3D) into three (D, L) slabs in the
    compute dtype (bf16 slabs for bf16 embeddings -> native bf16 MXU path)."""
    L, threeD = W.shape
    D = threeD // 3
    Wt = jnp.transpose(W.astype(jnp.float32))            # (3D, L)
    Wa = Wt[0 * D:1 * D].astype(dtype)                   # (D, L)
    Wb = Wt[1 * D:2 * D].astype(dtype)                   # (D, L)
    Wd = Wt[2 * D:3 * D].astype(dtype)                   # (D, L)
    bias = b.reshape(1, L).astype(jnp.float32)           # (1, L), added post-acc in f32
    return Wa, Wb, Wd, bias


def custom_softmax_loss(rep_a, rep_b, Wa, Wb, Wd, bias, labels, *,
                        tile_b=None, compute_probs=True):
    """rep_a, rep_b: (B, D) f32/bf16; Wa/Wb/Wd: (D, L); bias: (1, L) f32; labels: (B,)."""
    B, D = rep_a.shape
    L = Wa.shape[1]
    compute_dtype = rep_a.dtype
    probs_dtype = compute_dtype                    # probs stored in input dtype
    in_itemsize = jnp.dtype(compute_dtype).itemsize
    probs_itemsize = jnp.dtype(probs_dtype).itemsize

    # Tiny params: make sure dtypes match the reps (no-op if already prepared right).
    Wa = Wa.astype(compute_dtype)
    Wb = Wb.astype(compute_dtype)
    Wd = Wd.astype(compute_dtype)
    bias = jnp.asarray(bias, jnp.float32).reshape(1, L)
    labels2 = labels.reshape(B, 1).astype(jnp.int32)

    # --- tile selection -------------------------------------------------------
    pack = 16 if compute_dtype == jnp.bfloat16 else 8
    if tile_b is None:
        tile_b = 512                                # past HBM-roofline plateau; portable
    if tile_b >= B:
        tile_b = B                                  # full-dim block is always legal
    else:
        tile_b = max(pack, _round_down(tile_b, pack))

    vmem_limit = _vmem_limit_bytes()
    while (tile_b > pack and
           _estimate_vmem_bytes(tile_b, D, L, in_itemsize, probs_itemsize,
                                compute_probs) > vmem_limit):
        tile_b = max(pack, _round_down(tile_b // 2, pack))

    num_tiles = pl.cdiv(B, tile_b)
    # v7x megacore: prefer an even tile count so both TensorCores get equal work.
    if num_tiles > 1 and num_tiles % 2 == 1:
        cand = _round_up(pl.cdiv(B, num_tiles + 1), pack)
        if pack <= cand < B and pl.cdiv(B, cand) % 2 == 0:
            tile_b = cand
            num_tiles = pl.cdiv(B, cand)

    # --- specs ----------------------------------------------------------------
    tiled = lambda i: (i, 0)     # streamed per grid step
    full = lambda i: (0, 0)      # tiny, resident, reused every step

    in_specs = [
        pl.BlockSpec((tile_b, D), tiled),     # rep_a
        pl.BlockSpec((tile_b, D), tiled),     # rep_b
        pl.BlockSpec((D, L), full),           # Wa
        pl.BlockSpec((D, L), full),           # Wb
        pl.BlockSpec((D, L), full),           # Wd
        pl.BlockSpec((1, L), full),           # bias
        pl.BlockSpec((tile_b, 1), tiled),     # labels
    ]
    partial_spec = pl.BlockSpec((1, 8, 128), lambda i: (i, 0, 0))
    partial_shape = jax.ShapeDtypeStruct((num_tiles, 8, 128), jnp.float32)
    if compute_probs:
        out_specs = (pl.BlockSpec((tile_b, L), tiled), partial_spec)
        out_shape = (jax.ShapeDtypeStruct((B, L), probs_dtype), partial_shape)
    else:
        out_specs = partial_spec
        out_shape = partial_shape

    outs = pl.pallas_call(
        _make_kernel(B, tile_b, compute_probs),
        grid=(num_tiles,),
        in_specs=in_specs,
        out_specs=out_specs,
        out_shape=out_shape,
        compiler_params=pltpu.CompilerParams(
            dimension_semantics=("parallel",),     # shards tiles across TCs (v7x)
            vmem_limit_bytes=vmem_limit),
    )(rep_a, rep_b, Wa, Wb, Wd, bias, labels2)

    if compute_probs:
        probs, partials = outs
    else:
        probs, partials = None, outs

    # Mean reduction over the TRUE batch size (ragged rows already zeroed in-kernel).
    loss = jnp.sum(partials[:, 0, 0]) / B
    return loss, probs


# ----------------------------------------------------------------------------- reference + demo
def _reference(rep_a, rep_b, W, b, labels):
    feats = jnp.concatenate([rep_a, rep_b, jnp.abs(rep_a - rep_b)], axis=1)
    logits = feats @ W.T + b
    log_sm = jax.nn.log_softmax(logits, axis=-1)
    loss = -jnp.mean(jnp.take_along_axis(log_sm, labels[:, None], axis=1))
    return loss, jax.nn.softmax(logits, axis=-1)


if __name__ == "__main__":
    B = 20                     # not a multiple of TILE_B -> exercises ragged tile
    D = 32                     # sentence_embedding_dimension
    L = 3                      # num_labels (yes / no / maybe)
    TILE_B = 16                # small tile so the demo runs a real 2-step grid

    key = jax.random.PRNGKey(0)
    k1, k2, k3, k4, k5 = jax.random.split(key, 5)

    rep_a = jax.random.normal(k1, (B, D), dtype=jnp.float32)
    rep_b = jax.random.normal(k2, (B, D), dtype=jnp.float32)
    # Deterministic classifier params (nn.Linear(3*D, L)): weight (L, 3D), bias (L,)
    bound = 1.0 / jnp.sqrt(3.0 * D)
    W = jax.random.uniform(k3, (L, 3 * D), minval=-bound, maxval=bound,
                           dtype=jnp.float32)
    bvec = jax.random.uniform(k4, (L,), minval=-bound, maxval=bound,
                              dtype=jnp.float32)
    labels = jax.random.randint(k5, (B,), 0, L, dtype=jnp.int32)

    # One-time parameter prep (hoisted out of the per-call path).
    Wa32, Wb32, Wd32, bias = prepare_classifier_params(W, bvec, dtype=jnp.float32)
    Wa16, Wb16, Wd16, _ = prepare_classifier_params(W, bvec, dtype=jnp.bfloat16)

    ref_loss, ref_probs = _reference(rep_a, rep_b, W, bvec, labels)

    # f32 inputs: full f32 math, exact-ish.
    loss, probs = custom_softmax_loss(rep_a, rep_b, Wa32, Wb32, Wd32, bias, labels,
                                      tile_b=TILE_B)
    jax.block_until_ready((loss, probs))
    assert jnp.allclose(loss, ref_loss, atol=1e-5, rtol=1e-5)
    assert jnp.allclose(probs, ref_probs, atol=1e-5, rtol=1e-5)

    # Loss-only mode: no probs writeback at all.
    loss_only, probs_none = custom_softmax_loss(rep_a, rep_b, Wa32, Wb32, Wd32, bias,
                                                labels, tile_b=TILE_B,
                                                compute_probs=False)
    jax.block_until_ready(loss_only)
    assert probs_none is None
    assert jnp.allclose(loss_only, ref_loss, atol=1e-5, rtol=1e-5)

    # bf16 inputs (native encoder dtype): bf16 operands feed the MXU directly,
    # f32 accumulation; probs stored in bf16.
    ra_bf = rep_a.astype(jnp.bfloat16)
    rb_bf = rep_b.astype(jnp.bfloat16)
    loss_bf, probs_bf = custom_softmax_loss(ra_bf, rb_bf, Wa16, Wb16, Wd16, bias,
                                            labels, tile_b=TILE_B)
    jax.block_until_ready((loss_bf, probs_bf))
    ref_loss_bf, ref_probs_bf = _reference(ra_bf.astype(jnp.float32),
                                           rb_bf.astype(jnp.float32),
                                           W, bvec, labels)
    assert jnp.allclose(loss_bf, ref_loss_bf, atol=2e-2, rtol=2e-2)
    assert jnp.allclose(probs_bf.astype(jnp.float32), ref_probs_bf,
                        atol=2e-2, rtol=2e-2)

    print("KERNEL_OK")
</pallas_src>

<mosaic_0001>
module attributes {stable_mosaic.version = 11 : i64} {
  func.func @kernel(%arg0: i32, %arg1: memref<16x32xf32, #tpu.memory_space<vmem>>, %arg2: memref<16x32xf32, #tpu.memory_space<vmem>>, %arg3: memref<32x3xf32, #tpu.memory_space<vmem>>, %arg4: memref<32x3xf32, #tpu.memory_space<vmem>>, %arg5: memref<32x3xf32, #tpu.memory_space<vmem>>, %arg6: memref<1x3xf32, #tpu.memory_space<vmem>>, %arg7: memref<16x1xi32, #tpu.memory_space<vmem>>, %arg8: memref<16x3xf32, #tpu.memory_space<vmem>>, %arg9: memref<1x8x128xf32, #tpu.memory_space<vmem>>) attributes {dimension_semantics = [#tpu.dimension_semantics<parallel>], iteration_bounds = array<i64: 2>, scalar_prefetch = 0 : i64, scratch_operands = 0 : i64, tpu.core_type = #tpu.core_type<tc>, window_params = [{transform_indices = @transform_0, window_bounds = array<i64: 16, 32>}, {transform_indices = @transform_1, window_bounds = array<i64: 16, 32>}, {pipeline_mode = #tpu.pipeline_mode<synchronous>, transform_indices = @transform_2, window_bounds = array<i64: 32, 3>}, {pipeline_mode = #tpu.pipeline_mode<synchronous>, transform_indices = @transform_3, window_bounds = array<i64: 32, 3>}, {pipeline_mode = #tpu.pipeline_mode<synchronous>, transform_indices = @transform_4, window_bounds = array<i64: 32, 3>}, {pipeline_mode = #tpu.pipeline_mode<synchronous>, transform_indices = @transform_5, window_bounds = array<i64: 1, 3>}, {transform_indices = @transform_6, window_bounds = array<i64: 16, 1>}, {transform_indices = @transform_7, window_bounds = array<i64: 16, 3>}, {transform_indices = @transform_8, window_bounds = array<i64: 1, 8, 128>}]} {
    %c0 = arith.constant 0 : index
    %c0_0 = arith.constant 0 : index
    %0 = vector.load %arg1[%c0, %c0_0] : memref<16x32xf32, #tpu.memory_space<vmem>>, vector<16x32xf32>
    %c0_1 = arith.constant 0 : index
    %c0_2 = arith.constant 0 : index
    %1 = vector.load %arg2[%c0_1, %c0_2] : memref<16x32xf32, #tpu.memory_space<vmem>>, vector<16x32xf32>
    %2 = arith.subf %0, %1 : vector<16x32xf32>
    %3 = math.absf %2 : vector<16x32xf32>
    %c0_3 = arith.constant 0 : index
    %c0_4 = arith.constant 0 : index
    %4 = vector.load %arg3[%c0_3, %c0_4] : memref<32x3xf32, #tpu.memory_space<vmem>>, vector<32x3xf32>
    %cst = arith.constant dense<0.000000e+00> : vector<16x3xf32>
    %5 = tpu.matmul %0, %4, %cst {dimension_numbers = #tpu.dot_dimension_numbers<[1], [0], [0], [1], [0, 0, 1, 1], [], []>} : vector<16x32xf32>, vector<32x3xf32>, vector<16x3xf32> -> vector<16x3xf32>
    %c0_5 = arith.constant 0 : index
    %c0_6 = arith.constant 0 : index
    %6 = vector.load %arg4[%c0_5, %c0_6] : memref<32x3xf32, #tpu.memory_space<vmem>>, vector<32x3xf32>
    %cst_7 = arith.constant dense<0.000000e+00> : vector<16x3xf32>
    %7 = tpu.matmul %1, %6, %cst_7 {dimension_numbers = #tpu.dot_dimension_numbers<[1], [0], [0], [1], [0, 0, 1, 1], [], []>} : vector<16x32xf32>, vector<32x3xf32>, vector<16x3xf32> -> vector<16x3xf32>
    %8 = arith.addf %5, %7 : vector<16x3xf32>
    %c0_8 = arith.constant 0 : index
    %c0_9 = arith.constant 0 : index
    %9 = vector.load %arg5[%c0_8, %c0_9] : memref<32x3xf32, #tpu.memory_space<vmem>>, vector<32x3xf32>
    %cst_10 = arith.constant dense<0.000000e+00> : vector<16x3xf32>
    %10 = tpu.matmul %3, %9, %cst_10 {dimension_numbers = #tpu.dot_dimension_numbers<[1], [0], [0], [1], [0, 0, 1, 1], [], []>} : vector<16x32xf32>, vector<32x3xf32>, vector<16x3xf32> -> vector<16x3xf32>
    %11 = arith.addf %8, %10 : vector<16x3xf32>
    %c0_11 = arith.constant 0 : index
    %c0_12 = arith.constant 0 : index
    %12 = vector.load %arg6[%c0_11, %c0_12] : memref<1x3xf32, #tpu.memory_space<vmem>>, vector<1x3xf32>
    %13 = vector.broadcast %12 : vector<1x3xf32> to vector<16x3xf32>
    %14 = arith.addf %11, %13 : vector<16x3xf32>
    %cst_13 = arith.constant dense<0xFF800000> : vector<16xf32>
    %15 = vector.multi_reduction <maximumf>, %14, %cst_13 [1] : vector<16x3xf32> to vector<16xf32>
    %16 = vector.shape_cast %15 : vector<16xf32> to vector<16x1xf32>
    %17 = vector.broadcast %16 : vector<16x1xf32> to vector<16x3xf32>
    %18 = arith.subf %14, %17 : vector<16x3xf32>
    %19 = math.exp %18 : vector<16x3xf32>
    %cst_14 = arith.constant dense<0.000000e+00> : vector<16xf32>
    %20 = vector.multi_reduction <add>, %19, %cst_14 [1] : vector<16x3xf32> to vector<16xf32>
    %21 = vector.shape_cast %20 : vector<16xf32> to vector<16x1xf32>
    %22 = tpu.reciprocal %21 : vector<16x1xf32> -> vector<16x1xf32>
    %23 = vector.broadcast %22 : vector<16x1xf32> to vector<16x3xf32>
    %24 = arith.mulf %19, %23 : vector<16x3xf32>
    %c0_15 = arith.constant 0 : index
    %c0_16 = arith.constant 0 : index
    %25 = vector.load %arg8[%c0_15, %c0_16] : memref<16x3xf32, #tpu.memory_space<vmem>>, vector<16x3xf32>
    tpu.vector_store %arg8[%c0_15, %c0_16], %24 {strides = array<i32>} : memref<16x3xf32, #tpu.memory_space<vmem>>, vector<16x3xf32>,
    %c0_17 = arith.constant 0 : index
    %c0_18 = arith.constant 0 : index
    %26 = vector.load %arg7[%c0_17, %c0_18] : memref<16x1xi32, #tpu.memory_space<vmem>>, vector<16x1xi32>
    %27 = tpu.iota {dimensions = array<i32: 1>} : vector<16x3xi32>
    %28 = vector.broadcast %26 : vector<16x1xi32> to vector<16x3xi32>
    %29 = arith.cmpi eq, %27, %28 : vector<16x3xi32>
    %30 = arith.extui %29 : vector<16x3xi1> to vector<16x3xi32>
    %31 = arith.sitofp %30 : vector<16x3xi32> to vector<16x3xf32>
    %32 = arith.mulf %14, %31 : vector<16x3xf32>
    %cst_19 = arith.constant dense<0.000000e+00> : vector<16xf32>
    %33 = vector.multi_reduction <add>, %32, %cst_19 [1] : vector<16x3xf32> to vector<16xf32>
    %34 = vector.shape_cast %33 : vector<16xf32> to vector<16x1xf32>
    %35 = math.log %21 : vector<16x1xf32>
    %36 = arith.addf %16, %35 : vector<16x1xf32>
    %37 = arith.subf %36, %34 : vector<16x1xf32>
    %38 = tpu.iota {dimensions = array<i32: 0>} : vector<16x1xi32>
    %c16_i32 = arith.constant 16 : i32
    %39 = arith.muli %arg0, %c16_i32 : i32
    %40 = vector.broadcast %39 : i32 to vector<16x1xi32>
    %41 = arith.addi %40, %38 : vector<16x1xi32>
    %c20_i32 = arith.constant 20 : i32
    %42 = vector.broadcast %c20_i32 : i32 to vector<16x1xi32>
    %43 = arith.cmpi slt, %41, %42 : vector<16x1xi32>
    %cst_20 = arith.constant 0.000000e+00 : f32
    %44 = vector.broadcast %cst_20 : f32 to vector<16x1xf32>
    %45 = arith.select %43, %37, %44 : vector<16x1xi1>, vector<16x1xf32>
    %46 = vector.shape_cast %45 : vector<16x1xf32> to vector<1x16x1xf32>
    %cst_21 = arith.constant dense<0.000000e+00> : vector<1xf32>
    %47 = vector.multi_reduction <add>, %46, %cst_21 [1, 2] : vector<1x16x1xf32> to vector<1xf32>
    %48 = vector.shape_cast %47 : vector<1xf32> to vector<1x1x1xf32>
    %49 = vector.extract %48[0, 0, 0] : f32 from vector<1x1x1xf32>
    %50 = vector.broadcast %49 : f32 to vector<1x1xf32>
    %51 = vector.shape_cast %50 : vector<1x1xf32> to vector<1x1xf32>
    %52 = vector.broadcast %51 : vector<1x1xf32> to vector<8x128xf32>
    %c0_22 = arith.constant 0 : index
    %c0_23 = arith.constant 0 : index
    %c0_24 = arith.constant 0 : index
    %53 = vector.load %arg9[%c0_22, %c0_23, %c0_24] : memref<1x8x128xf32, #tpu.memory_space<vmem>>, vector<1x8x128xf32>
    %54 = vector.shape_cast %53 : vector<1x8x128xf32> to vector<8x128xf32>
    %55 = vector.shape_cast %52 : vector<8x128xf32> to vector<1x8x128xf32>
    tpu.vector_store %arg9[%c0_22, %c0_23, %c0_24], %55 {strides = array<i32>} : memref<1x8x128xf32, #tpu.memory_space<vmem>>, vector<1x8x128xf32>,
    return
  }
  func.func @transform_0(%arg0: i32) -> (i32, i32) {
    %c0_i32 = arith.constant 0 : i32
    %c0_i32_0 = arith.constant 0 : i32
    return %arg0, %c0_i32 : i32, i32
  }
  func.func @transform_1(%arg0: i32) -> (i32, i32) {
    %c0_i32 = arith.constant 0 : i32
    %c0_i32_0 = arith.constant 0 : i32
    return %arg0, %c0_i32 : i32, i32
  }
  func.func @transform_2(%arg0: i32) -> (i32, i32) {
    %c0_i32 = arith.constant 0 : i32
    %c0_i32_0 = arith.constant 0 : i32
    %c0_i32_1 = arith.constant 0 : i32
    return %c0_i32, %c0_i32_0 : i32, i32
  }
  func.func @transform_3(%arg0: i32) -> (i32, i32) {
    %c0_i32 = arith.constant 0 : i32
    %c0_i32_0 = arith.constant 0 : i32
    %c0_i32_1 = arith.constant 0 : i32
    return %c0_i32, %c0_i32_0 : i32, i32
  }
  func.func @transform_4(%arg0: i32) -> (i32, i32) {
    %c0_i32 = arith.constant 0 : i32
    %c0_i32_0 = arith.constant 0 : i32
    %c0_i32_1 = arith.constant 0 : i32
    return %c0_i32, %c0_i32_0 : i32, i32
  }
  func.func @transform_5(%arg0: i32) -> (i32, i32) {
    %c0_i32 = arith.constant 0 : i32
    %c0_i32_0 = arith.constant 0 : i32
    %c0_i32_1 = arith.constant 0 : i32
    return %c0_i32, %c0_i32_0 : i32, i32
  }
  func.func @transform_6(%arg0: i32) -> (i32, i32) {
    %c0_i32 = arith.constant 0 : i32
    %c0_i32_0 = arith.constant 0 : i32
    return %arg0, %c0_i32 : i32, i32
  }
  func.func @transform_7(%arg0: i32) -> (i32, i32) {
    %c0_i32 = arith.constant 0 : i32
    %c0_i32_0 = arith.constant 0 : i32
    return %arg0, %c0_i32 : i32, i32
  }
  func.func @transform_8(%arg0: i32) -> (i32, i32, i32) {
    %c0_i32 = arith.constant 0 : i32
    %c0_i32_0 = arith.constant 0 : i32
    %c0_i32_1 = arith.constant 0 : i32
    return %arg0, %c0_i32, %c0_i32_0 : i32, i32, i32
  }
}

</mosaic_0001>

<bundles_post_ra>
// kernel: tpu_custom_call.1
= control target key start
LH: loop header
LB: loop body
LE: loop exit
PB: predicated region body
PF: predicated region fallthrough
CT: control target
= control target key end

     0   :  { %s1692_s0 = inlined_call_operand.vmem [shape: f32[20,32], index: 0, kind: input, shape index: {}]   ;;  %s1693_s1 = inlined_call_operand.vmem [shape: f32[20,32], index: 1, kind: input, shape index: {}]   ;;  %s1694_s2 = inlined_call_operand.vmem [shape: f32[32,3], index: 2, kind: input, shape index: {}]   ;;  %s1695_s3 = inlined_call_operand.vmem [shape: f32[32,3], index: 3, kind: input, shape index: {}]   ;;  %s1696_s4 = inlined_call_operand.vmem [shape: f32[32,3], index: 4, kind: input, shape index: {}]   ;;  %s1697_s5 = inlined_call_operand.vmem [shape: f32[1,3], index: 5, kind: input, shape index: {}]   ;;  %s1698_s6 = inlined_call_operand.vmem [shape: s32[20,1], index: 6, kind: input, shape index: {}]   ;;  %s1699_s7 = inlined_call_operand.vmem [shape: f32[20,3], index: 7, kind: output, shape index: {0}]   ;;  %s1700_s8 = inlined_call_operand.hbm [shape: f32[2,8,128], index: 8, kind: output, shape index: {1}]  }
   0x1   :  { %1701 = sst [smem:[#allocation6_spill]] %s1692_s0 }
   0x2   :  { %1702 = sst [smem:[#allocation7_spill]] %s1693_s1 }
   0x3   :  { %1703 = sst [smem:[#allocation8_spill]] %s1694_s2 }
   0x4   :  { %14 = vsyncpa [#allocation4], 0 }
   0x5   :  { %16 = vsyncpa [#allocation4 + $0x1], 0  ;;  %s1493_s27 = smov 0   ;;  %s1495_s28 = smov 0  }
   0x6   :  { %s1497_s29 = smov 0   ;;  %s1499_s30 = smov 0  }
   0x7 LB: > { %s1514_s9 = sadd.s32 4294967295, %s1411_s30   ;;  %s1073_s10 = sadd.s32 4294967294, %s1411_s30   ;;  %s1411_s30 = sphi %s1499_s30, %s1713_s30   ;;  %s1407_s29 = sphi %s1497_s29, %s1712_s29   ;;  %s1403_s28 = sphi %s1495_s28, %s1711_s28   ;;  %s1399_s27 = sphi %s1493_s27, %s1710_s27  }
   0x8   : > { %s1518_s11 = sadd.s32 1, %s1411_s30   ;;  %s191_s12 = sadd.s32 1, %s1407_s29 }
   0x9   : > { %s188_s13 = ssub.s32 %s1411_s30, %s1518_s11  ;;  %p201_p0 = scmp.ne.s32.totalorder %s1407_s29, %s1403_s28 }
   0xa   : > { %p189_p1 = scmp.eq.s32.totalorder %s188_s13, 0  ;;  %p202_p2 = scmp.eq.s32.totalorder %s1514_s9, 1 }
   0xb   : > { %p233_p3 = scmp.ne.s32.totalorder %s1403_s28, %s1399_s27  ;;  %p234_p4 = scmp.eq.s32.totalorder %s1073_s10, 1 }
   0xc   : > { %s1529_s14 = scalar_select %p189_p1, %s1407_s29, %s191_s12  }
   0xd   : > { %p1531_p5 = por %p202_p2, %p201_p0  ;;  %p1535_p6 = por %p234_p4, %p233_p3 }
   0xe   : > { %p1076_p7 = scmp.ge.s32.totalorder %s1411_s30, 1  ;;  %p315_p8 = scmp.lt.s32.totalorder %s1411_s30, 3 }
  0x10   : > { %p316_p9 = pnand %p1076_p7, %p315_p8 }
  0x11   : > { %s1706_s2 = sld [smem:[#allocation8_spill]] (!%p316_p9)  ;;  %s1551_s23 = sshll.u32 (!%p316_p9), %s1514_s9, 1  ;;  %v434_v5 = vld [vmem:[%s1695_s3] sm:$0xff] (!%p316_p9)  ;;  %v435_v6 = vld [vmem:[%s1695_s3 + $0x8] sm:$0xff] (!%p316_p9)  ;;  %v1445_v7 = vmov (!%p316_p9), 0   ;;  %v436_v12 = vld [vmem:[%s1695_s3 + $0x10] sm:$0xff] (!%p316_p9)  ;;  %v724_v42 = vlaneseq (!%p316_p9) }
  0x12   : > { %319 = sbr.rel (%p316_p9) target bundleno = 866 (0x362), region = 48  ;;  %p380_p10 = scmp.lt.s32.totalorder (!%p316_p9), %s1551_s23, 2  ;;  %1303 = vset.pattern.permute.xlu1 (!%p316_p9), %v1445_v7  ;;  %1304 = vset.pattern.permute.xlu0 (!%p316_p9), %v1445_v7  ;;  %v1168_v9 = vpack.c.bf16 (!%p316_p9), %v435_v6, %v434_v5  ;;  %v601_v10 = vld [vmem:[%s1696_s4] sm:$0xff] (!%p316_p9)  ;;  %v602_v11 = vld [vmem:[%s1696_s4 + $0x8] sm:$0xff] (!%p316_p9)  ;;  %v437_v13 = vld [vmem:[%s1695_s3 + $0x18] sm:$0xff] (!%p316_p9)  ;;  %vm438_vm0 = vcmask (!%p316_p9), 261120  }
  0x13   : > { %v1172_v14 = vpack.c.bf16 (!%p316_p9), %v437_v13, %v436_v12  ;;  %v1184_v15 = vpack.c.bf16 (!%p316_p9), %v602_v11, %v601_v10  ;;  %s1707_s0 = sld [smem:[#allocation6_spill]] (!%p316_p9)  ;;  %v603_v16 = vld [vmem:[%s1696_s4 + $0x10] sm:$0xff] (!%p316_p9)  ;;  %v604_v17 = vld [vmem:[%s1696_s4 + $0x18] sm:$0xff] (!%p316_p9)  ;;  %s1708_s1 = sld [smem:[#allocation7_spill]] (!%p316_p9)  ;;  %v1091_v33 = vld [vmem:[%s1697_s5] ss:$0 sm:$0xff] (!%p316_p9) }
  0x14   : > { %1169 = vmatprep.subr.bf16.mxu1 (!%p316_p9), %v1168_v9  ;;  %v1188_v24 = vpack.c.bf16 (!%p316_p9), %v604_v17, %v603_v16  ;;  %vm697_vm1 = vcmask (!%p316_p9), 23552   ;;  %v725_v47 = vand.u32 (!%p316_p9), 127, %v724_v42  ;;  %v1446_v50 = vmov (!%p316_p9), 0.0   ;;  %s1607_s13 = sand.u32 (!%p316_p9), 1, %s1403_s28  }
  0x15   : > { %1171 = vmatpush3.bf16.msra.mxu1 (!%p316_p9), %v1168_v9  ;;  %s1077_s18 = sshll.u32 (!%p316_p9), %s1607_s13, 4  ;;  %v755_v63 = vshrl.u32 (!%p316_p9), %v724_v42, 7  ;;  %vm765_vm6 = vcmask (!%p316_p9), 7168   ;;  %s1078_s20 = sshll.u32 (!%p316_p9), %s1607_s13, 3 }
  0x16   : > { %1173 = vmatprep.subr.bf16.mxu1 (!%p316_p9), %v1172_v14  ;;  %s1613_s19 = scalar_lea.vmem (!%p316_p9), [#allocation2], %s1077_s18   ;;  %s1620_s22 = scalar_lea.vmem (!%p316_p9), [#allocation3], %s1078_s20 }
  0x17   : > { %v430_v0 = vld [vmem:[%s1706_s2] sm:$0xff] (!%p316_p9)  ;;  %v431_v1 = vld [vmem:[%s1706_s2 + $0x8] sm:$0xff] (!%p316_p9)  ;;  %v432_v2 = vld [vmem:[%s1706_s2 + $0x10] sm:$0xff] (!%p316_p9) }
  0x18   : > { %v1176_v3 = vpack.c.bf16 (!%p316_p9), %v431_v1, %v430_v0  ;;  %v433_v4 = vld [vmem:[%s1706_s2 + $0x18] sm:$0xff] (!%p316_p9) }
  0x19   : > { %v1180_v8 = vpack.c.bf16 %v433_v4, %v432_v2  ;;  %s381_s24 = scalar_select %p380_p10, %s1551_s23, 2  ;;  %1175 = vmatpush3.bf16.msra.mxu1 %v1172_v14  ;;  %v756_v4 = vadd.s32 8, %v755_v63 }
  0x1a   : > { %1177 = vmatprep.subr.bf16.mxu0 %v1176_v3 }
  0x1b   : > { %1179 = vmatpush3.bf16.msra.mxu0 %v1176_v3  ;;  %s1080_s10 = sshll.u32 %s381_s24, 3 }
  0x1c   : > { %1181 = vmatprep.subr.bf16.mxu0 %v1180_v8  ;;  %s383_s17 = scalar_lea.vmem %s1707_s0, %s1080_s10  ;;  %s397_s24 = scalar_lea.vmem %s1708_s1, %s1080_s10 }
  0x1d   : > { %v422_v18 = vld [vmem:[%s383_s17] sm:$0xff]  ;;  %s411_s12 = scalar_lea.vmem %s1698_s6, %s1080_s10  ;;  %v423_v20 = vld [vmem:[%s383_s17 + $0x8] sm:$0xff]  ;;  %s1094_s17 = sshll.u32 %s1514_s9, 4 }
  0x1e   : > { %v424_v19 = vld [vmem:[%s397_s24] sm:$0xff]  ;;  %1154 = vmatprep.mubr.msk.f32.mxu0 %vm438_vm0, %v422_v18  ;;  %v425_v21 = vld [vmem:[%s397_s24 + $0x8] sm:$0xff]  ;;  %v758_v1 = vstv %s1094_s17  ;;  %s793_s24 = ssub.s32 (%p1531_p5), 3, %s1551_s23  ;;  %s1632_s2 = scalar_lea.vmem (%p1531_p5), %s1699_s7, %s1094_s17  }
  0x1f   : > { %1183 = vmatpush3.bf16.msra.mxu0 %v1180_v8  ;;  %v426_v22 = vsub.f32 %v422_v18, %v424_v19  ;;  %v722_v23 = vld [vmem:[%s411_s12] sm:$0xff]  ;;  %1143 = vmatprep.mubr.msk.f32.mxu1 %vm438_vm0, %v424_v19  ;;  %v427_v26 = vsub.f32 %v423_v20, %v425_v21  ;;  %v723_v27 = vld [vmem:[%s411_s12 + $0x8] sm:$0xff]  ;;  %v759_v6 = vadd.s32 %v758_v1, %v755_v63  ;;  %p794_p11 = scmp.lt.s32.totalorder (%p1531_p5), %s793_s24, 2 }
  0x20   : > { %1185 = vmatprep.subr.bf16.mxu0 %v1184_v15  ;;  %727 = vperm.xlu1 %1303, %v722_v23   ;;  %v760_v12 = vadd.s32 %v758_v1, %v756_v4 }
  0x21   : > { %v428_v25 = vand.u32 2147483647, %v426_v22  ;;  %1144 = vmatmul.mubr.msk.f32.vlgmr.msra.gmra.mrb[0].mxu1 %vm438_vm0, %v425_v21  ;;  %v429_v28 = vand.u32 2147483647, %v427_v26  ;;  %vm761_vm4 = vcmp.lt.s32.totalorder %v759_v6, 20 }
  0x22   : > { %1155 = vmatmul.mubr.msk.f32.vlgmr.msra.gmra.mrb[0].mxu0 %vm438_vm0, %v423_v20  ;;  %vm762_vm5 = vcmp.lt.s32.totalorder %v760_v12, 20 }
  0x23   : > { %1187 = vmatpush3.bf16.msra.mxu0 %v1184_v15  ;;  %1165 = vmatprep.mubr.msk.f32.mxu0 %vm438_vm0, %v428_v25 }
  0x24   : > { %1189 = vmatprep.subr.bf16.mxu0 %v1188_v24  ;;  %730 = vperm.xlu1 %1303, %v723_v27  }
  0x27   : > { %1191 = vmatpush3.bf16.msra.mxu0 %v1188_v24 }
  0x2a   : > { %1166 = vmatmul.mubr.msk.f32.vlgmr.msra.gmra.mrb[0].mxu0 %vm438_vm0, %v429_v28 }
  0x9f   : > { %v728_v45 = vpop.permute.xlu1 %727 }
  0xa0   : > { %vm732_vm2 = vcmp.eq.s32.totalorder %v725_v47, %v728_v45 }
  0xa1   : > { %v1092_v51 = vsel %vm732_vm2, 1.0, %v1446_v50 }
  0xa3   : > { %v731_v49 = vpop.permute.xlu1 %730 }
  0xa4   : > { %vm733_vm3 = vcmp.eq.s32.totalorder %v725_v47, %v731_v49 }
  0xa5   : > { %v1093_v55 = vsel %vm733_vm3, 1.0, %v1446_v50 }
  0xf4   : > { %v1145_v29 = vpop.f32.mrb[0].mxu1 }
  0xf5   : > { %v511_v30 = vpop.f32.mrb[1].mxu1 }
  0xfd   : > { %v1167_v31 = vpop.f32.mrb[0].mxu0 }
  0xfe   : > { %v1192_v32 = vadd.f32 %v1167_v31, %v1145_v29  ;;  %v677_v34 = vpop.f32.mrb[1].mxu0 }
  0xff   : > { %v1193_v35 = vadd.f32 %v677_v34, %v511_v30 }
 0x100   : > { %v696_v37 = vadd.f32 %v1192_v32, %v1091_v33 }
 0x101   : > { %v695_v36 = vadd.f32 %v1193_v35, %v1091_v33 }
 0x102   : > { %v701_v39 = vsel %vm697_vm1, %v696_v37, -inf  ;;  %v739_v59 = vmul.f32 %v1093_v55, %v696_v37 }
 0x103   : > { %v698_v38 = vsel %vm697_vm1, %v695_v36, -inf  ;;  %v738_v54 = vmul.f32 %v1092_v51, %v695_v36 }
 0x104   : > { %699 = vmax.xlane.f32.xlu0 %v698_v38  ;;  %v743_v60 = vsel %vm697_vm1, %v739_v59, 0.0 }
 0x105   : > { %v740_v57 = vsel %vm697_vm1, %v738_v54, 0.0 }
 0x108   : > { %702 = vmax.xlane.f32.xlu0 %v701_v39 }
 0x191   : > { %v700_v40 = vpop.xlane.xlu0 %699 }
 0x192   : > { %v704_v41 = vsub.f32 %v695_v36, %v700_v40 }
 0x194   : > { %v706_v43 = vmul.f32 1.442695, %v704_v41 }
 0x195   : > { %v703_v44 = vpop.xlane.xlu0 %702 }
 0x196   : > { %1305 = vpow2.f32 %v706_v43  ;;  %v705_v46 = vsub.f32 %v696_v37, %v703_v44 }
 0x198   : > { %v708_v48 = vmul.f32 1.442695, %v705_v46 }
 0x19a   : > { %1307 = vpow2.f32 %v708_v48 }
 0x1a0   : > { %v1306_v52 = vpop.eup %1305 }
 0x1a1   : > { %v710_v53 = vsel %vm697_vm1, %v1306_v52, 0.0 }
 0x1a2   : > { %711 = vadd.xlane.f32.xlu0 %v710_v53 }
 0x1a4   : > { %v1308_v56 = vpop.eup %1307 }
 0x1a5   : > { %v713_v58 = vsel %vm697_vm1, %v1308_v56, 0.0 }
 0x1a6   : > { %741 = vadd.xlane.f32.xlu0 %v740_v57  ;;  %714 = vadd.xlane.f32.xlu1 %v713_v58 }
 0x1aa   : > { %744 = vadd.xlane.f32.xlu0 %v743_v60 }
 0x22f   : > { %v712_v61 = vpop.xlane.xlu0 %711 }
 0x230   : > { %1309 = vrcp.f32 %v712_v61 }
 0x231   : > { %1311 = vlog2.f32 %v712_v61 }
 0x233   : > { %v715_v62 = vpop.xlane.xlu1 %714  ;;  %v742_v7 = vpop.xlane.xlu0 %741 }
 0x234   : > { %1313 = vrcp.f32 %v715_v62 }
 0x235   : > { %1315 = vlog2.f32 %v715_v62 }
 0x237   : > { %v745_v16 = vpop.xlane.xlu0 %744 }
 0x23a   : > { %v1310_v0 = vpop.eup %1309 }
 0x23b   : > { %v1312_v2 = vpop.eup %1311  ;;  %v718_v3 = vmul.f32 %v1310_v0, %v1306_v52 }
 0x23c   : > { %v747_v5 = vmul.f32 0.6931472, %v1312_v2 }
 0x23d   : > { %720 = vst.msk [vmem:[%s1613_s19] sm:$0xff] %vm697_vm1, %v718_v3 }
 0x23e   : > { %v1314_v8 = vpop.eup %1313  ;;  %v750_v9 = vadd.f32 %v747_v5, %v700_v40 }
 0x23f   : > { %v1316_v10 = vpop.eup %1315  ;;  %v719_v11 = vmul.f32 %v1314_v8, %v1308_v56 }
 0x240   : > { %v749_v13 = vmul.f32 0.6931472, %v1316_v10  ;;  %v752_v14 = vsub.f32 %v750_v9, %v742_v7 }
 0x241   : > { %721 = vst.msk [vmem:[%s1613_s19 + $0x8] sm:$0xff] %vm697_vm1, %v719_v11 }
 0x242   : > { %v751_v15 = vadd.f32 %v749_v13, %v703_v44  ;;  %v763_v17 = vsel %vm761_vm4, %v752_v14, 0.0 }
 0x243   : > { %v766_v20 = vsel %vm765_vm6, %v763_v17, 0.0 }
 0x244   : > { %v753_v18 = vsub.f32 %v751_v15, %v745_v16 }
 0x246   : > { %v764_v19 = vsel %vm762_vm5, %v753_v18, 0.0 }
 0x247   : > { %v767_v21 = vsel %vm765_vm6, %v764_v19, 0.0 }
 0x248   : > { %v768_v22 = vadd.f32 %v767_v21, %v766_v20 }
 0x24a   : > { %769 = vadd.xlane.f32.xlu0 %v768_v22 }
 0x2d7   : > { %v770_v23 = vpop.xlane.xlu0 %769 }
 0x2d8   : > { %v771_v24 = vrot.slane %v770_v23, 4 }
 0x2da   : > { %v772_v25 = vadd.f32 %v771_v24, %v770_v23 }
 0x2dc   : > { %v773_v26 = vrot.slane %v772_v25, 2 }
 0x2de   : > { %v774_v27 = vadd.f32 %v773_v26, %v772_v25 }
 0x2e0   : > { %v775_v28 = vrot.slane %v774_v27, 1 }
 0x2e2   : > { %v776_v29 = vadd.f32 %v775_v28, %v774_v27 }
 0x2e4   : > { %1196 = vpush %v776_v29 }
 0x311   : > { %791 = sbr.rel (!%p1531_p5) target bundleno = 841 (0x349), region = 52 }
 0x315   : > { %s1197_s21 = spop %1196 }
 0x316   : > { %v778_v30 = vstv %s1197_s21 }
 0x317   : > { %779 = vst [vmem:[%s1620_s22] sm:$0xff] %v778_v30 }
 0x318   : > { %s1715_s24 = smov (!%p794_p11, %s793_s24), 2 }
 0x319   : > { %s1098_s10 = sshll.u32 %s1715_s24, 7 }
 0x31a   : > { %p1101_p12 = scmp.eq.s32.totalorder %s1098_s10, 0 }
 0x31b   : > { %s1638_s18 = sshrl.u32 (!%p1101_p12), %s1715_s24, 1 }
 0x31c   : > { %802 = sbr.rel (%p1101_p12) target bundleno = 841 (0x349), region = 56  ;;  %p1102_p13 = scmp.le.s32.totalorder (!%p1101_p12), %s1638_s18, 0 }
 0x323   : > { %1008 = sbr.rel (%p1102_p13) target bundleno = 820 (0x334), region = 155  ;;  %s1413_s23 = smov (!%p1102_p13), %s1632_s2  }
 0x324   : > { %s1417_s20 = smov (!%p1102_p13), %s1613_s19   ;;  %s1421_s21 = smov (!%p1102_p13), 0  }
 0x325   : > { %s1425_s17 = smov (!%p1102_p13), 0  }
 0x32a LB: >> { %v866_v31 = vld [vmem:[%s1419_s20] sm:$0xff]  ;;  %v868_v32 = vld [vmem:[%s1419_s20 + $0x8] sm:$0xff]  ;;  %s870_s26 = sadd.s32 1, %s1423_s21  ;;  %s860_s17 = sadd.s32 1, %s1427_s17   ;;  %s1427_s17 = sphi %s1425_s17, %s860_s17   ;;  %s1423_s21 = sphi %s1421_s21, %s1422_s21   ;;  %s1419_s20 = sphi %s1417_s20, %s875_s20   ;;  %s1415_s23 = sphi %s1413_s23, %s876_s23  }
 0x32b   : >> { %867 = vst [vmem:[%s1415_s23] sm:$0xff] %v866_v31  ;;  %869 = vst [vmem:[%s1415_s23 + $0x8] sm:$0xff] %v868_v32  ;;  %p871_p0 = scmp.ge.s32.totalorder %s870_s26, %s1638_s18  ;;  %p859_p1 = scmp.ge.s32.totalorder %s860_s17, %s1638_s18 }
 0x32d   : >> { %s1717_s26 = smov (%p871_p0, %s870_s26), 0  ;;  %862 = sbr.rel (!%p859_p1) target bundleno = 810 (0x32a), region = 161 }
 0x32e   : >> { %s1103_s12 = sshll.u32 %s1717_s26, 4  ;;  %s1422_s21 = smov %s1717_s26  }
 0x32f   : >> { %s875_s20 = scalar_lea.vmem %s1613_s19, %s1103_s12 [#allocation2]   ;;  %s876_s23 = scalar_lea.vmem %s1632_s2, %s1103_s12  }
 0x334 PF: > { %s1648_s10 = sand.u32 1, %s1715_s24   ;;  %s1115_s21 = sshll.u32 %s1638_s18, 4 }
 0x335   : > { %s881_s25 = scalar_lea.vmem %s1613_s19, %s1115_s21 [#allocation2]   ;;  %s883_s0 = scalar_lea.vmem %s1632_s2, %s1115_s21  }
 0x336   : > { %p1108_p2 = scmp.le.s32.totalorder %s1648_s10, 0 }
 0x337   : > { %s1429_s12 = smov (!%p1108_p2), %s883_s0   ;;  %s1433_s1 = smov (!%p1108_p2), %s881_s25  }
 0x338   : > { %1022 = sbr.rel (%p1108_p2) target bundleno = 841 (0x349), region = 166  ;;  %s1437_s23 = smov (!%p1108_p2), 0  }
 0x339   : > { %s1441_s20 = smov (!%p1108_p2), 0  }
 0x33f LB: >> { %v893_v33 = vld [vmem:[%s1435_s1] sm:$0xff]  ;;  %s895_s24 = sadd.s32 1, %s1439_s23  ;;  %s887_s20 = sadd.s32 1, %s1443_s20   ;;  %s1443_s20 = sphi %s1441_s20, %s887_s20   ;;  %s1439_s23 = sphi %s1437_s23, %s1438_s23   ;;  %s1435_s1 = sphi %s1433_s1, %s900_s1   ;;  %s1431_s12 = sphi %s1429_s12, %s901_s12  }
 0x340   : >> { %894 = vst [vmem:[%s1431_s12] sm:$0xff] %v893_v33  ;;  %p896_p3 = scmp.ge.s32.totalorder %s895_s24, %s1648_s10  ;;  %p886_p4 = scmp.ge.s32.totalorder %s887_s20, %s1648_s10 }
 0x342   : >> { %s1719_s24 = smov (%p896_p3, %s895_s24), 0  ;;  %889 = sbr.rel (!%p886_p4) target bundleno = 831 (0x33f), region = 172 }
 0x343   : >> { %s1109_s19 = sshll.u32 %s1719_s24, 3  ;;  %s1438_s23 = smov %s1719_s24  }
 0x344   : >> { %s900_s1 = scalar_lea.vmem %s881_s25, %s1109_s19 [#allocation2]   ;;  %s901_s12 = scalar_lea.vmem %s883_s0, %s1109_s19  }
 0x349 PF: > { %s1111_s2 = sshll.u32 %s1514_s9, 7  ;;  %s914_s18 = sshll.u32 %s1620_s22, 4  ;;  %s915_s18 = int_to_ptr.vmem [resolvable:$true] %s914_s18 }
 0x34a   : > { %s912_s21 = scalar_lea.hbm %s1700_s8, %s1111_s2  ;;  %s1317_s23 = scalar_lea.vmem %s915_s18, 128 }
 0x34b   : > { %p1318_p7 = scmp.ne.s32.totalorder %s915_s18, %s1317_s23  ;;  %s1447_s1 = smov [#allocation3]  }
 0x34c   : > { %s1321_s12 = sshll.u32 %s1447_s1, 4  ;;  %s1322_s12 = int_to_ptr.vmem [resolvable:$false] %s1321_s12 }
 0x34d   : > { %p1319_p8 = pnand %p1318_p7, %p1531_p5  ;;  %s1323_s0 = scalar_lea.vmem %s1322_s12, 256 }
 0x34e   : > { %p1324_p10 = scmp.lt.s32.totalorder %s915_s18, %s1322_s12  ;;  %p1325_p11 = scmp.lt.s32.totalorder %s1323_s0, %s1317_s23 }
 0x34f   : > { %p1320_p9 = pneg %p1319_p8 }
 0x350   : > { %p1326_p12 = por %p1325_p11, %p1324_p10 }
 0x352   : > { %p1327_p13 = pnand %p1326_p12, %p1320_p9 }
 0x354   : > { %1330 = shalt.err (!%p1327_p13)
}
 0x355   : > { %s1331_s9 = scalar_lea.hbm %s912_s21, 128  ;;  %s1335_s10 = scalar_lea.hbm %s1700_s8, 256 }
 0x356   : > { %p1332_p0 = scmp.ne.s32.totalorder %s912_s21, %s1331_s9  ;;  %p1336_p3 = scmp.lt.u32.totalorder %s912_s21, %s1700_s8 }
 0x357   : > { %p1337_p4 = scmp.lt.u32.totalorder %s1335_s10, %s1331_s9  ;;  %p1339_p8 = scmp.lt.u32.totalorder %s1331_s9, %s912_s21 }
 0x358   : > { %p1333_p1 = pnand %p1332_p0, %p1531_p5 }
 0x359   : > { %p1338_p7 = por %p1337_p4, %p1336_p3 }
 0x35a   : > { %p1334_p2 = pneg %p1333_p1 }
 0x35b   : > { %p1340_p10 = por %p1339_p8, %p1338_p7 }
 0x35d   : > { %p1341_p9 = pnand %p1340_p10, %p1334_p2 }
 0x35f   : > { %1344 = shalt.err (!%p1341_p9)
}
 0x360   : > { %s1709_s19 = scalar_lea.sflag [#allocation4], %s1607_s13 }
 0x361   : > { %1198 = dma.vmem_to_hbm [thread:$0]  (%p1531_p5), %s915_s18, 128, %s912_s21, %s1709_s19  }
 0x362 PF: > { %p1204_p11 = scmp.ge.s32.totalorder %s1411_s30, 2  ;;  %s933_s2 = sand.u32 1, %s1399_s27  }
 0x363   : > { %s934_s17 = scalar_lea.sflag [#allocation4], %s933_s2 }
 0x364   : > { %p1201_p12 = pnand %p1204_p11, %p1535_p6 }
 0x366   : > { %1394 = dma.done.wait (!%p1201_p12), %s934_s17, 128  }
 0x367   : > { %1396 = vsyncadd (!%p1201_p12), %s934_s17, 4294967168  ;;  %p19_p13 = scmp.ge.s32.totalorder %s1518_s11, 4   ;;  %s1710_s27 = smov %s1403_s28 }
 0x368   : > { %s1711_s28 = smov %s1407_s29  ;;  %s1712_s29 = smov %s1529_s14 }
 0x369   : > { %s1713_s30 = smov %s1518_s11  ;;  %21 = sbr.rel (!%p19_p13) target bundleno = 7 (0x7), region = 183 }
 0x370   :  { %939 = vsyncpa [#allocation4], 1 }
 0x371   :  { %941 = vsyncpa [#allocation4 + $0x1], 1 }

</bundles_post_ra>
